<compile_context>
chip_gen: v6e
topology: v6e:2x2x1
jax: 0.10.0
libtpu: 0.0.40
codegen_flags: <defaults>
</compile_context>

<pallas_src>
import jax
import jax.numpy as jnp
from jax.experimental import pallas as pl
from jax.experimental.pallas import tpu as pltpu


def dqn_kernel(x_ref, w1_ref, b1_ref, w2_ref, b2_ref, o_ref):
    # x_ref: [4, TB]  w1_ref: [16, 4]  b1_ref: [16, 1]
    # w2_ref: [2, 16] b2_ref: [2, 1]   o_ref:  [2, TB]
    x = x_ref[...]                                       # [4, TB] lane-dense
    h = jnp.dot(w1_ref[...], x,
                preferred_element_type=jnp.float32)      # [16, TB]
    h = jnp.maximum(h + b1_ref[...], 0.0)                # bias bcast over lanes
    y = jnp.dot(w2_ref[...], h,
                preferred_element_type=jnp.float32)      # [2, TB]
    o_ref[...] = (y + b2_ref[...]).astype(o_ref.dtype)


def dqn_forward(x, w1, b1, w2, b2, *, tb=512):
    """DQN forward.

    x : [B, 4] float32
    w1: [16, 4], b1: [16]   (torch nn.Linear fc1 layout)
    w2: [2, 16], b2: [2]    (torch nn.Linear fc2 layout)
    returns [B, 2] float32
    """
    B = x.shape[0]
    # Lane tile: multiple of 128, no larger than needed for this batch.
    tb = max(128, min(tb, pl.cdiv(B, 128) * 128))
    b_pad = pl.cdiv(B, tb) * tb

    # Wrapper-side layout plumbing: transpose + zero-pad batch onto lanes.
    xT = jnp.zeros((4, b_pad), x.dtype).at[:, :B].set(x.T)
    b1c = b1.reshape(16, 1).astype(jnp.float32)
    b2c = b2.reshape(2, 1).astype(jnp.float32)

    grid = (b_pad // tb,)
    yT = pl.pallas_call(
        dqn_kernel,
        out_shape=jax.ShapeDtypeStruct((2, b_pad), jnp.float32),
        grid=grid,
        in_specs=[
            pl.BlockSpec((4, tb), lambda i: (0, i)),      # x^T tile (lane-dense)
            pl.BlockSpec((16, 4), lambda i: (0, 0)),      # w1 (VMEM-resident)
            pl.BlockSpec((16, 1), lambda i: (0, 0)),      # b1
            pl.BlockSpec((2, 16), lambda i: (0, 0)),      # w2
            pl.BlockSpec((2, 1), lambda i: (0, 0)),       # b2
        ],
        out_specs=pl.BlockSpec((2, tb), lambda i: (0, i)),  # y^T tile (lane-dense)
        compiler_params=pltpu.CompilerParams(
            dimension_semantics=("parallel",)),
    )(xT, w1, b1c, w2, b2c)

    return yT[:, :B].T  # back to [B, 2]


def init_params(key):
    """Synthetic init matching the PyTorch module (torch weight layouts).

    fc1.weight ~ N(0, 0.1), shape [16, 4];  fc2.weight ~ N(0, 0.1), shape [2, 16].
    Biases follow torch.nn.Linear default: U(-1/sqrt(fan_in), 1/sqrt(fan_in)).
    """
    k1, k2, k3, k4 = jax.random.split(key, 4)
    w1 = 0.1 * jax.random.normal(k1, (16, 4), jnp.float32)
    w2 = 0.1 * jax.random.normal(k2, (2, 16), jnp.float32)
    b1 = jax.random.uniform(k3, (16,), jnp.float32,
                            minval=-1.0 / jnp.sqrt(4.0),
                            maxval=1.0 / jnp.sqrt(4.0))
    b2 = jax.random.uniform(k4, (2,), jnp.float32,
                            minval=-1.0 / jnp.sqrt(16.0),
                            maxval=1.0 / jnp.sqrt(16.0))
    return w1, b1, w2, b2


def _ref_forward(x, w1, b1, w2, b2):
    # Pure-JAX reference with torch nn.Linear semantics: x @ W.T + b.
    return jnp.maximum(x @ w1.T + b1, 0.0) @ w2.T + b2


if __name__ == "__main__":
    key = jax.random.PRNGKey(0)
    k_x, k_x2, k_p = jax.random.split(key, 3)
    w1, b1, w2, b2 = init_params(k_p)

    # Primary check: CartPole observation (4 features), small batch of 2.
    x = jax.random.normal(k_x, (2, 4), jnp.float32)
    out = jax.block_until_ready(dqn_forward(x, w1, b1, w2, b2))
    ref = _ref_forward(x, w1, b1, w2, b2)
    assert out.shape == (2, 2)
    assert jnp.allclose(out, ref, atol=1e-5, rtol=1e-5)

    # Secondary check: exercises padding + multi-tile grid (2 x 512-lane tiles).
    x2 = jax.random.normal(k_x2, (640, 4), jnp.float32)
    out2 = jax.block_until_ready(dqn_forward(x2, w1, b1, w2, b2))
    ref2 = _ref_forward(x2, w1, b1, w2, b2)
    assert out2.shape == (640, 2)
    assert jnp.allclose(out2, ref2, atol=1e-5, rtol=1e-5)

    print("KERNEL_OK")
</pallas_src>

<mosaic_0001>
module attributes {stable_mosaic.version = 11 : i64} {
  func.func @dqn_kernel(%arg0: i32, %arg1: memref<4x128xf32, #tpu.memory_space<vmem>>, %arg2: memref<16x4xf32, #tpu.memory_space<vmem>>, %arg3: memref<16x1xf32, #tpu.memory_space<vmem>>, %arg4: memref<2x16xf32, #tpu.memory_space<vmem>>, %arg5: memref<2x1xf32, #tpu.memory_space<vmem>>, %arg6: memref<2x128xf32, #tpu.memory_space<vmem>>) attributes {dimension_semantics = [#tpu.dimension_semantics<parallel>], iteration_bounds = array<i64: 1>, scalar_prefetch = 0 : i64, scratch_operands = 0 : i64, tpu.core_type = #tpu.core_type<tc>, window_params = [{transform_indices = @transform_0, window_bounds = array<i64: 4, 128>}, {pipeline_mode = #tpu.pipeline_mode<synchronous>, transform_indices = @transform_1, window_bounds = array<i64: 16, 4>}, {pipeline_mode = #tpu.pipeline_mode<synchronous>, transform_indices = @transform_2, window_bounds = array<i64: 16, 1>}, {pipeline_mode = #tpu.pipeline_mode<synchronous>, transform_indices = @transform_3, window_bounds = array<i64: 2, 16>}, {pipeline_mode = #tpu.pipeline_mode<synchronous>, transform_indices = @transform_4, window_bounds = array<i64: 2, 1>}, {transform_indices = @transform_5, window_bounds = array<i64: 2, 128>}]} {
    %c0 = arith.constant 0 : index
    %c0_0 = arith.constant 0 : index
    %0 = vector.load %arg1[%c0, %c0_0] : memref<4x128xf32, #tpu.memory_space<vmem>>, vector<4x128xf32>
    %c0_1 = arith.constant 0 : index
    %c0_2 = arith.constant 0 : index
    %1 = vector.load %arg2[%c0_1, %c0_2] : memref<16x4xf32, #tpu.memory_space<vmem>>, vector<16x4xf32>
    %cst = arith.constant dense<0.000000e+00> : vector<16x128xf32>
    %2 = tpu.matmul %1, %0, %cst {dimension_numbers = #tpu.dot_dimension_numbers<[1], [0], [0], [1], [0, 0, 1, 1], [], []>} : vector<16x4xf32>, vector<4x128xf32>, vector<16x128xf32> -> vector<16x128xf32>
    %c0_3 = arith.constant 0 : index
    %c0_4 = arith.constant 0 : index
    %3 = vector.load %arg3[%c0_3, %c0_4] : memref<16x1xf32, #tpu.memory_space<vmem>>, vector<16x1xf32>
    %4 = vector.broadcast %3 : vector<16x1xf32> to vector<16x128xf32>
    %5 = arith.addf %2, %4 : vector<16x128xf32>
    %cst_5 = arith.constant 0.000000e+00 : f32
    %6 = vector.broadcast %cst_5 : f32 to vector<16x128xf32>
    %7 = arith.maximumf %5, %6 : vector<16x128xf32>
    %c0_6 = arith.constant 0 : index
    %c0_7 = arith.constant 0 : index
    %8 = vector.load %arg4[%c0_6, %c0_7] : memref<2x16xf32, #tpu.memory_space<vmem>>, vector<2x16xf32>
    %cst_8 = arith.constant dense<0.000000e+00> : vector<2x128xf32>
    %9 = tpu.matmul %8, %7, %cst_8 {dimension_numbers = #tpu.dot_dimension_numbers<[1], [0], [0], [1], [0, 0, 1, 1], [], []>} : vector<2x16xf32>, vector<16x128xf32>, vector<2x128xf32> -> vector<2x128xf32>
    %c0_9 = arith.constant 0 : index
    %c0_10 = arith.constant 0 : index
    %10 = vector.load %arg5[%c0_9, %c0_10] : memref<2x1xf32, #tpu.memory_space<vmem>>, vector<2x1xf32>
    %11 = vector.broadcast %10 : vector<2x1xf32> to vector<2x128xf32>
    %12 = arith.addf %9, %11 : vector<2x128xf32>
    %c0_11 = arith.constant 0 : index
    %c0_12 = arith.constant 0 : index
    %13 = vector.load %arg6[%c0_11, %c0_12] : memref<2x128xf32, #tpu.memory_space<vmem>>, vector<2x128xf32>
    tpu.vector_store %arg6[%c0_11, %c0_12], %12 {strides = array<i32>} : memref<2x128xf32, #tpu.memory_space<vmem>>, vector<2x128xf32>,
    return
  }
  func.func @transform_0(%arg0: i32) -> (i32, i32) {
    %c0_i32 = arith.constant 0 : i32
    %c0_i32_0 = arith.constant 0 : i32
    return %c0_i32, %arg0 : i32, i32
  }
  func.func @transform_1(%arg0: i32) -> (i32, i32) {
    %c0_i32 = arith.constant 0 : i32
    %c0_i32_0 = arith.constant 0 : i32
    %c0_i32_1 = arith.constant 0 : i32
    return %c0_i32, %c0_i32_0 : i32, i32
  }
  func.func @transform_2(%arg0: i32) -> (i32, i32) {
    %c0_i32 = arith.constant 0 : i32
    %c0_i32_0 = arith.constant 0 : i32
    %c0_i32_1 = arith.constant 0 : i32
    return %c0_i32, %c0_i32_0 : i32, i32
  }
  func.func @transform_3(%arg0: i32) -> (i32, i32) {
    %c0_i32 = arith.constant 0 : i32
    %c0_i32_0 = arith.constant 0 : i32
    %c0_i32_1 = arith.constant 0 : i32
    return %c0_i32, %c0_i32_0 : i32, i32
  }
  func.func @transform_4(%arg0: i32) -> (i32, i32) {
    %c0_i32 = arith.constant 0 : i32
    %c0_i32_0 = arith.constant 0 : i32
    %c0_i32_1 = arith.constant 0 : i32
    return %c0_i32, %c0_i32_0 : i32, i32
  }
  func.func @transform_5(%arg0: i32) -> (i32, i32) {
    %c0_i32 = arith.constant 0 : i32
    %c0_i32_0 = arith.constant 0 : i32
    return %c0_i32, %arg0 : i32, i32
  }
}

</mosaic_0001>

<bundles_post_ra>
// kernel: tpu_custom_call.1
= control target key start
LH: loop header
LB: loop body
LE: loop exit
PB: predicated region body
PF: predicated region fallthrough
CT: control target
= control target key end

     0   :  { %vm43_vm0 = vcmask 1043456   ;;  %vm36_vm1 = vcmask 31744   ;;  %s328_s0 = inlined_call_operand.vmem [shape: f32[4,128], index: 0, kind: input, shape index: {}]   ;;  %s329_s1 = inlined_call_operand.vmem [shape: f32[16,4], index: 1, kind: input, shape index: {}]   ;;  %s330_s2 = inlined_call_operand.vmem [shape: f32[16,1], index: 2, kind: input, shape index: {}]   ;;  %s331_s3 = inlined_call_operand.vmem [shape: f32[2,16], index: 3, kind: input, shape index: {}]   ;;  %s332_s4 = inlined_call_operand.vmem [shape: f32[2,1], index: 4, kind: input, shape index: {}]   ;;  %s333_s5 = inlined_call_operand.hbm [shape: f32[2,128], index: 5, kind: output, shape index: {}]  }
   0x1   :  { %v21_v0 = vld [vmem:[%s328_s0] sm:$0xf]  ;;  %v23_v2 = vld [vmem:[%s329_s1 + $0x8] sm:$0xff] }
   0x2   :  { %v22_v1 = vld [vmem:[%s329_s1] sm:$0xff]  ;;  %230 = vmatprep.subr.msk.mxu0 %vm43_vm0, %v21_v0  ;;  %v25_v3 = vld [vmem:[%s330_s2 + $0x8] sm:$0xff] }
   0x3   :  { %232 = vmatprep.mubr.msk.f32.mxu0 %vm36_vm1, %v22_v1 }
   0x4   :  { %10 = vsyncpa [#allocation3], 0  ;;  %231 = vmatpush3.msk.msra.mxu0 %vm43_vm0, %v21_v0  ;;  %v270_v4 = vmov 0   ;;  %v24_v5 = vld [vmem:[%s330_s2] sm:$0xff]  ;;  %v271_v6 = vmov 0.0   ;;  %vm272_vm2 = vmmov 0  }
   0x5   :  { %246 = vset.pattern.permute.xlu0 %v270_v4  ;;  %233 = vmatmul.mubr.msk.f32.vlgmr.msra.gmra.mxu0 %vm36_vm1, %v23_v2  ;;  %v125_v7 = vld [vmem:[%s332_s4] sm:$0x3]  ;;  %vm131_vm3 = vcmask 130048   ;;  %s273_s4 = smov [#allocation2]  }
   0x6   :  { %33 = vperm.xlu0 %246, %v25_v3   ;;  %247 = vset.pattern.permute.xlu1 %v270_v4  ;;  %v124_v16 = vld [vmem:[%s331_s3] sm:$0x3]  ;;  %s212_s29 = sshll.u32 %s273_s4, 4  ;;  %s213_s29 = int_to_ptr.vmem [resolvable:$true] %s212_s29 }
   0x7   :  { %235 = vmatprep.subr.mxu1 %v271_v6  ;;  %239 = vmatprep.mubr.msk.f32.mxu1 %vm272_vm2, %v271_v6  ;;  %s248_s30 = scalar_lea.vmem %s213_s29, 32  ;;  %p253_p1 = scmp.lt.s32.totalorder %s213_s29, %s213_s29 }
   0x8   :  { %128 = vperm.xlu1 %247, %v125_v7   ;;  %p249_p0 = scmp.ne.s32.totalorder %s213_s29, %s248_s30  ;;  %p254_p2 = scmp.lt.s32.totalorder %s248_s30, %s248_s30 }
   0xa   :  { %28 = vperm.xlu0 %246, %v24_v5   ;;  %p255_p3 = por %p254_p2, %p253_p1 }
   0xc   :  { %p256_p4 = pnand %p255_p3, %p249_p0 }
  0x81   :  { %v34_v8 = vpop.permute.xlu0 %33 }
  0x83   :  { %v129_v17 = vpop.permute.xlu1 %128 }
  0x85   :  { %v29_v11 = vpop.permute.xlu0 %28 }
  0xc5   :  { %v234_v9 = vpop.f32.mrf.mxu0 }
  0xc6   :  { %v119_v10 = vadd.f32 %v234_v9, %v34_v8 }
  0xc7   :  { %v113_v12 = vpop.f32.mrf.mxu0 }
  0xc8   :  { %v123_v13 = vmax.f32 %v119_v10, 0.0  ;;  %v114_v14 = vadd.f32 %v113_v12, %v29_v11 }
  0xca   :  { %v122_v15 = vmax.f32 %v114_v14, 0.0  ;;  %236 = vmatpush3.msra.mxu1 %v123_v13 }
  0xcb   :  { %237 = vmatprep.subr.mxu1 %v271_v6 }
  0xcc   :  { %238 = vmatpush3.msra.mxu1 %v122_v15 }
  0xcd   :  { %240 = vmatmul.mubr.msk.f32.vlgmr.msra.gmra.mxu1 %vm131_vm3, %v124_v16 }
 0x18d   :  { %v201_v18 = vpop.f32.mrf.mxu1 }
 0x18e   :  { %v202_v19 = vadd.f32 %v201_v18, %v129_v17 }
 0x18f   :  { %v241_v20 = vpop.f32.mrf.mxu1 }
 0x190   :  { %205 = vst [vmem:[#allocation2] sm:$0x3] %v202_v19 }
 0x191   :  { %259 = shalt.err (!%p256_p4)
}
 0x192   :  { %215 = dma.vmem_to_hbm [thread:$0]  %s213_s29, 32, %s333_s5, [#allocation3]  }
 0x193   :  { %268 = dma.done.wait [#allocation3], 32  }
 0x194   :  { %269 = vsyncadd [#allocation3], 4294967264 }
 0x195   :  { %219 = vsyncpa [#allocation3], 1 }

</bundles_post_ra>
